<compile_context>
chip_gen: v7x
topology: tpu7x:2x2x1
jax: 0.10.0
libtpu: 0.0.40
codegen_flags: <defaults>
</compile_context>

<pallas_src>
import functools

import jax
import jax.numpy as jnp
from jax.experimental import pallas as pl
from jax.experimental.pallas import tpu as pltpu

C_IN = 136           # gc2 in_features (fixed by the module)
C_OUT = 30           # gc2 out_features
LEAKY_SLOPE = 0.01   # F.leaky_relu default negative_slope


def dgcn_kernel(a1_ref, x_ref, wt_ref, bt_ref, out_ref, *,
                n_valid, n_pad, tile_m, single_tile):
    """One batch element, one adjacency column tile (grid = (B, num_m)).

    a1_ref : (1, Np)       f32   per-node mean_C + max_C (precomputed in f32)
    x_ref  : (C_IN, Np)    bf16  node features, zero-padded nodes, resident across m
    wt_ref : (C_OUT, C_IN) f32   gc2 weight, pre-transposed
    bt_ref : (C_OUT, 1)    f32   gc2 bias as a column
    out_ref: (C_OUT, Np)   f32   transposed output, accumulated over the tile axis
    """
    m = pl.program_id(1)
    ms = pl.multiple_of(m * tile_m, tile_m)

    a1_row = a1_ref[...]                                            # (1, Np)
    a1_m = a1_row if single_tile else a1_ref[:, pl.ds(ms, tile_m)]  # (1, TM)
    a1_m_col = jnp.transpose(a1_m)                                  # (TM, 1) small XLU transpose

    # adj rows for this tile: adj[tile, :] = sigmoid(a1_tile ⊗ a1).
    # sigmoid >= 0, so torch.abs() is a no-op.  adj is symmetric, so the
    # matching columns adj[:, tile] are just the transpose (sigmoid computed once).
    adj_rows_bf = jax.nn.sigmoid(a1_m_col * a1_row).astype(jnp.bfloat16)  # (TM, Np)
    adj_cols_bf = jnp.transpose(adj_rows_bf)                              # (Np, TM)

    # xg[:, tile] = x @ adj[:, tile]; leaky_relu.  bf16 operands, f32 accumulation.
    xg = jnp.dot(x_ref[...], adj_cols_bf,
                 preferred_element_type=jnp.float32)                # (C_IN, TM)
    xg = jnp.where(xg > 0, xg, LEAKY_SLOPE * xg)

    # gc2 "support", transposed: support_T[:, tile] = W^T @ xg[:, tile] (small, f32)
    support = jnp.dot(wt_ref[...], xg,
                      preferred_element_type=jnp.float32)           # (C_OUT, TM)

    if n_valid != n_pad:
        # Zero-padded node columns must not contribute to out = adj @ support.
        col = ms + jax.lax.broadcasted_iota(jnp.int32, (1, tile_m), 1)
        support = support * (col < n_valid).astype(jnp.float32)

    contrib = jnp.dot(support.astype(jnp.bfloat16), adj_rows_bf,
                      preferred_element_type=jnp.float32)           # (C_OUT, Np)

    if single_tile:
        out_ref[...] = contrib + bt_ref[...]
    else:
        @pl.when(m == 0)
        def _():
            out_ref[...] = jnp.broadcast_to(bt_ref[...], out_ref.shape)
        out_ref[...] += contrib


def _vmem_limit_bytes():
    """~75% of physical per-core VMEM (leaves Mosaic headroom); conservative fallback."""
    cap = 64 * 1024 * 1024   # v7x-sized fallback (works on every generation)
    try:
        info = pltpu.get_tpu_info()
        c = getattr(info, "vmem_capacity_bytes", None)
        if c:
            cap = int(c)
    except Exception:
        pass
    return (cap * 3) // 4


def _choose_tile_m(n_pad, vmem_limit):
    """Largest column tile whose full footprint fits the VMEM budget."""
    # Resident, Np-scaling blocks (double-buffered): x bf16 + out f32 + a1 row f32.
    resident = (2 * C_IN * 2 + 2 * C_OUT * 4 + 2 * 8 * 4) * n_pad
    slack = 4 << 20          # Mosaic internal scratch / small temporaries
    adj_budget = vmem_limit - resident - slack
    # Live adjacency intermediates per tile: f32 sigmoid + 2 bf16 copies ≈ 8 B/elem.
    for t in (n_pad, 4096, 2048, 1024, 512, 256, 128):
        if t <= n_pad and n_pad % t == 0 and 8 * n_pad * t <= adj_budget:
            return t
    # TODO(synk): for very large graphs (n_pad >~ 16K on 64-MiB-VMEM parts) also
    # tile the adjacency row (Np) axis instead of only shrinking the column tile.
    return 128


def dynamic_graph_convolution(x, w_gc2, b_gc2):
    """x: (B, C_IN, N) f32, w_gc2: (C_IN, C_OUT) f32, b_gc2: (1, C_OUT) f32.

    Returns (B, N, C_OUT) f32, matching the PyTorch module's forward().
    """
    B, C, N = x.shape
    assert C == C_IN, f"in_features must be {C_IN} (fixed by gc2)"

    n_pad = ((N + 127) // 128) * 128       # lane-dense node axis
    vmem_limit = _vmem_limit_bytes()
    tile_m = _choose_tile_m(n_pad, vmem_limit)
    num_m = n_pad // tile_m

    # a1 computed once per node, in f32, BEFORE the bf16 cast of x.
    a1 = jnp.mean(x, axis=1) + jnp.max(x, axis=1)                  # (B, N) f32
    if n_pad != N:
        x = jnp.pad(x, ((0, 0), (0, 0), (0, n_pad - N)))
        a1 = jnp.pad(a1, ((0, 0), (0, n_pad - N)))
    x_bf = x.astype(jnp.bfloat16)                                  # halves HBM + VMEM for x
    a1_r = a1[:, None, :]                                          # (B, 1, n_pad)
    w_t = jnp.transpose(w_gc2)                                     # (C_OUT, C_IN)
    b_t = jnp.reshape(b_gc2, (C_OUT, 1))                           # (C_OUT, 1)

    kernel = functools.partial(dgcn_kernel, n_valid=N, n_pad=n_pad,
                               tile_m=tile_m, single_tile=(num_m == 1))

    # TODO(synk): on v7x with B == 1 only one TensorCore is used; a node-slab
    # split would repeat the dominant xg matmul, so it is intentionally omitted.
    out_t = pl.pallas_call(
        kernel,
        out_shape=jax.ShapeDtypeStruct((B, C_OUT, n_pad), jnp.float32),
        grid_spec=pltpu.PrefetchScalarGridSpec(
            num_scalar_prefetch=0,
            grid=(B, num_m),
            in_specs=[
                pl.BlockSpec((None, 1, n_pad), lambda b, m: (b, 0, 0)),     # a1 (per batch)
                pl.BlockSpec((None, C_IN, n_pad), lambda b, m: (b, 0, 0)),  # x bf16 (resident across m)
                pl.BlockSpec((C_OUT, C_IN), lambda b, m: (0, 0)),           # W^T (shared)
                pl.BlockSpec((C_OUT, 1), lambda b, m: (0, 0)),              # bias (shared)
            ],
            out_specs=pl.BlockSpec((None, C_OUT, n_pad), lambda b, m: (b, 0, 0)),
        ),
        compiler_params=pltpu.CompilerParams(
            dimension_semantics=("parallel", "arbitrary"),
            vmem_limit_bytes=int(vmem_limit),
        ),
    )(a1_r, x_bf, w_t, b_t)                                        # (B, C_OUT, Np)

    # Back to the module's (B, N, C_OUT) layout; drop node padding.
    return jnp.transpose(out_t[:, :, :N], (0, 2, 1))


def reference(x, w, b):
    """Pure-JAX f32 reference matching the PyTorch forward exactly."""
    a1 = jnp.mean(x, axis=1) + jnp.max(x, axis=1)                      # (B, N)
    adj = jnp.abs(jax.nn.sigmoid(a1[:, :, None] * a1[:, None, :]))     # (B, N, N)
    xg = jnp.einsum('bcn,bnm->bcm', x, adj)                            # (B, C, N)
    xg = jnp.where(xg > 0, xg, LEAKY_SLOPE * xg)
    support = jnp.einsum('bcn,cf->bnf', xg, w)                         # (B, N, 30)
    return jnp.einsum('bnm,bmf->bnf', adj, support) + b[None, :, :]    # (B, N, 30)


if __name__ == "__main__":
    B, N = 2, 8  # small batch / num_nodes; channel dim fixed at 136 by gc2

    key = jax.random.PRNGKey(0)
    kx, kw, kb = jax.random.split(key, 3)
    x = jax.random.normal(kx, (B, C_IN, N), dtype=jnp.float32)
    w_gc2 = jax.random.normal(kw, (C_IN, C_OUT), dtype=jnp.float32) * 0.05
    b_gc2 = jax.random.normal(kb, (1, C_OUT), dtype=jnp.float32) * 0.05

    out = jax.block_until_ready(dynamic_graph_convolution(x, w_gc2, b_gc2))
    ref = reference(x, w_gc2, b_gc2)

    assert out.shape == (B, N, C_OUT), out.shape
    assert bool(jnp.isfinite(out).all())
    # bf16 MXU operands (f32 accumulation) -> compare with a bf16-appropriate tolerance.
    rel = jnp.max(jnp.abs(out - ref)) / (jnp.max(jnp.abs(ref)) + 1e-6)
    assert rel < 2e-2, f"normwise rel err = {rel}"

    print("KERNEL_OK")
</pallas_src>

<mosaic_0001>
module attributes {stable_mosaic.version = 11 : i64} {
  func.func @dgcn_kernel(%arg0: i32, %arg1: i32, %arg2: memref<1x1x128xf32, #tpu.memory_space<vmem>>, %arg3: memref<1x136x128xbf16, #tpu.memory_space<vmem>>, %arg4: memref<30x136xf32, #tpu.memory_space<vmem>>, %arg5: memref<30x1xf32, #tpu.memory_space<vmem>>, %arg6: memref<1x30x128xf32, #tpu.memory_space<vmem>>) attributes {dimension_semantics = [#tpu.dimension_semantics<parallel>, #tpu.dimension_semantics<arbitrary>], iteration_bounds = array<i64: 2, 1>, scalar_prefetch = 0 : i64, scratch_operands = 0 : i64, tpu.core_type = #tpu.core_type<tc>, window_params = [{transform_indices = @transform_0, window_bounds = array<i64: 1, 1, 128>}, {transform_indices = @transform_1, window_bounds = array<i64: 1, 136, 128>}, {pipeline_mode = #tpu.pipeline_mode<synchronous>, transform_indices = @transform_2, window_bounds = array<i64: 30, 136>}, {pipeline_mode = #tpu.pipeline_mode<synchronous>, transform_indices = @transform_3, window_bounds = array<i64: 30, 1>}, {transform_indices = @transform_4, window_bounds = array<i64: 1, 30, 128>}]} {
    %c128_i32 = arith.constant 128 : i32
    %0 = arith.muli %arg1, %c128_i32 : i32
    %1 = tpu.assume_multiple %0, 128 : i32
    %c0 = arith.constant 0 : index
    %c0_0 = arith.constant 0 : index
    %c0_1 = arith.constant 0 : index
    %2 = vector.load %arg2[%c0, %c0_0, %c0_1] : memref<1x1x128xf32, #tpu.memory_space<vmem>>, vector<1x1x128xf32>
    %3 = vector.shape_cast %2 : vector<1x1x128xf32> to vector<1x128xf32>
    %4 = tpu.transpose %3, [1, 0] : vector<1x128xf32> -> vector<128x1xf32>
    %5 = vector.broadcast %4 : vector<128x1xf32> to vector<128x128xf32>
    %6 = vector.broadcast %3 : vector<1x128xf32> to vector<128x128xf32>
    %7 = arith.mulf %5, %6 : vector<128x128xf32>
    %8 = arith.negf %7 : vector<128x128xf32>
    %9 = math.exp %8 : vector<128x128xf32>
    %cst = arith.constant 1.000000e+00 : f32
    %10 = vector.broadcast %cst : f32 to vector<128x128xf32>
    %11 = arith.addf %10, %9 : vector<128x128xf32>
    %12 = arith.divf %10, %11 : vector<128x128xf32>
    %13 = arith.truncf %12 : vector<128x128xf32> to vector<128x128xbf16>
    %14 = tpu.transpose %13, [1, 0] : vector<128x128xbf16> -> vector<128x128xbf16>
    %c0_2 = arith.constant 0 : index
    %c0_3 = arith.constant 0 : index
    %c0_4 = arith.constant 0 : index
    %15 = vector.load %arg3[%c0_2, %c0_3, %c0_4] : memref<1x136x128xbf16, #tpu.memory_space<vmem>>, vector<1x136x128xbf16>
    %16 = vector.shape_cast %15 : vector<1x136x128xbf16> to vector<136x128xbf16>
    %cst_5 = arith.constant dense<0.000000e+00> : vector<136x128xf32>
    %17 = tpu.matmul %16, %14, %cst_5 {dimension_numbers = #tpu.dot_dimension_numbers<[1], [0], [0], [1], [0, 0, 1, 1], [], []>} : vector<136x128xbf16>, vector<128x128xbf16>, vector<136x128xf32> -> vector<136x128xf32>
    %cst_6 = arith.constant 0.000000e+00 : f32
    %18 = vector.broadcast %cst_6 : f32 to vector<136x128xf32>
    %19 = arith.cmpf ogt, %17, %18 : vector<136x128xf32>
    %cst_7 = arith.constant 0.00999999977 : f32
    %20 = vector.broadcast %cst_7 : f32 to vector<136x128xf32>
    %21 = arith.mulf %20, %17 : vector<136x128xf32>
    %22 = arith.select %19, %17, %21 : vector<136x128xi1>, vector<136x128xf32>
    %c0_8 = arith.constant 0 : index
    %c0_9 = arith.constant 0 : index
    %23 = vector.load %arg4[%c0_8, %c0_9] : memref<30x136xf32, #tpu.memory_space<vmem>>, vector<30x136xf32>
    %cst_10 = arith.constant dense<0.000000e+00> : vector<30x128xf32>
    %24 = tpu.matmul %23, %22, %cst_10 {dimension_numbers = #tpu.dot_dimension_numbers<[1], [0], [0], [1], [0, 0, 1, 1], [], []>} : vector<30x136xf32>, vector<136x128xf32>, vector<30x128xf32> -> vector<30x128xf32>
    %25 = tpu.iota {dimensions = array<i32: 1>} : vector<1x128xi32>
    %26 = vector.broadcast %1 : i32 to vector<1x128xi32>
    %27 = arith.addi %26, %25 : vector<1x128xi32>
    %c8_i32 = arith.constant 8 : i32
    %28 = vector.broadcast %c8_i32 : i32 to vector<1x128xi32>
    %29 = arith.cmpi slt, %27, %28 : vector<1x128xi32>
    %30 = arith.extui %29 : vector<1x128xi1> to vector<1x128xi32>
    %31 = arith.sitofp %30 : vector<1x128xi32> to vector<1x128xf32>
    %32 = vector.broadcast %31 : vector<1x128xf32> to vector<30x128xf32>
    %33 = arith.mulf %24, %32 : vector<30x128xf32>
    %34 = arith.truncf %33 : vector<30x128xf32> to vector<30x128xbf16>
    %cst_11 = arith.constant dense<0.000000e+00> : vector<30x128xf32>
    %35 = tpu.matmul %34, %13, %cst_11 {dimension_numbers = #tpu.dot_dimension_numbers<[1], [0], [0], [1], [0, 0, 1, 1], [], []>} : vector<30x128xbf16>, vector<128x128xbf16>, vector<30x128xf32> -> vector<30x128xf32>
    %c0_12 = arith.constant 0 : index
    %c0_13 = arith.constant 0 : index
    %36 = vector.load %arg5[%c0_12, %c0_13] : memref<30x1xf32, #tpu.memory_space<vmem>>, vector<30x1xf32>
    %37 = vector.broadcast %36 : vector<30x1xf32> to vector<30x128xf32>
    %38 = arith.addf %35, %37 : vector<30x128xf32>
    %c0_14 = arith.constant 0 : index
    %c0_15 = arith.constant 0 : index
    %c0_16 = arith.constant 0 : index
    %39 = vector.load %arg6[%c0_14, %c0_15, %c0_16] : memref<1x30x128xf32, #tpu.memory_space<vmem>>, vector<1x30x128xf32>
    %40 = vector.shape_cast %39 : vector<1x30x128xf32> to vector<30x128xf32>
    %41 = vector.shape_cast %38 : vector<30x128xf32> to vector<1x30x128xf32>
    tpu.vector_store %arg6[%c0_14, %c0_15, %c0_16], %41 {strides = array<i32>} : memref<1x30x128xf32, #tpu.memory_space<vmem>>, vector<1x30x128xf32>,
    return
  }
  func.func @transform_0(%arg0: i32, %arg1: i32) -> (i32, i32, i32) {
    %c0_i32 = arith.constant 0 : i32
    %c0_i32_0 = arith.constant 0 : i32
    %c0_i32_1 = arith.constant 0 : i32
    return %arg0, %c0_i32, %c0_i32_0 : i32, i32, i32
  }
  func.func @transform_1(%arg0: i32, %arg1: i32) -> (i32, i32, i32) {
    %c0_i32 = arith.constant 0 : i32
    %c0_i32_0 = arith.constant 0 : i32
    %c0_i32_1 = arith.constant 0 : i32
    return %arg0, %c0_i32, %c0_i32_0 : i32, i32, i32
  }
  func.func @transform_2(%arg0: i32, %arg1: i32) -> (i32, i32) {
    %c0_i32 = arith.constant 0 : i32
    %c0_i32_0 = arith.constant 0 : i32
    %c0_i32_1 = arith.constant 0 : i32
    return %c0_i32, %c0_i32_0 : i32, i32
  }
  func.func @transform_3(%arg0: i32, %arg1: i32) -> (i32, i32) {
    %c0_i32 = arith.constant 0 : i32
    %c0_i32_0 = arith.constant 0 : i32
    %c0_i32_1 = arith.constant 0 : i32
    return %c0_i32, %c0_i32_0 : i32, i32
  }
  func.func @transform_4(%arg0: i32, %arg1: i32) -> (i32, i32, i32) {
    %c0_i32 = arith.constant 0 : i32
    %c0_i32_0 = arith.constant 0 : i32
    %c0_i32_1 = arith.constant 0 : i32
    return %arg0, %c0_i32, %c0_i32_0 : i32, i32, i32
  }
}

</mosaic_0001>

<bundles_post_ra>
// kernel: tpu_custom_call.1
= control target key start
LH: loop header
LB: loop body
LE: loop exit
PB: predicated region body
PF: predicated region fallthrough
CT: control target
= control target key end

     0   :  { %9 = vsyncpa [#allocation3], 0  ;;  %s1769_s0 = inlined_call_operand.vmem [shape: f32[2,1,128], index: 0, kind: input, shape index: {}]   ;;  %s1770_s1 = inlined_call_operand.hbm [shape: bf16[2,136,128], index: 1, kind: input, shape index: {}]   ;;  %s1771_s2 = inlined_call_operand.hbm [shape: f32[30,136], index: 2, kind: input, shape index: {}]   ;;  %s1772_s3 = inlined_call_operand.vmem [shape: f32[30,1], index: 3, kind: input, shape index: {}]   ;;  %s1773_s4 = inlined_call_operand.vmem [shape: f32[2,30,128], index: 4, kind: output, shape index: {}]  }
   0x1   :  { %11 = vsyncpa [#allocation3 + $0x1], 0 }
   0x2   :  { %12 = vsyncpa [#allocation5], 0  ;;  %s1481_s15 = smov 0   ;;  %s1483_s16 = smov 0  }
   0x3   :  { %s1485_s17 = smov 0   ;;  %s1487_s18 = smov 0  }
   0x4   :  { %s1489_s19 = smov 0   ;;  %s1491_s20 = smov 0  }
   0x5 LB: > { %s1014_s21 = sadd.s32 4294967295, %s1444_s20   ;;  %p76_p0 = scmp.ne.s32.totalorder %s1428_s16, %s1424_s15  ;;  %s1444_s20 = sphi %s1491_s20, %s18_s20   ;;  %s1440_s19 = sphi %s1489_s19, %s1790_s19   ;;  %s1436_s18 = sphi %s1487_s18, %s1789_s18   ;;  %s1432_s17 = sphi %s1485_s17, %s1788_s17   ;;  %s1428_s16 = sphi %s1483_s16, %s1787_s16   ;;  %s1424_s15 = sphi %s1481_s15, %s1786_s15  }
   0x6   : > { %p1511_p1 = scmp.eq.s32.totalorder %s1014_s21, 0  ;;  %p1016_p2 = scmp.ge.s32.totalorder %s1444_s20, 1 }
   0x7   : > { %p155_p3 = scmp.lt.s32.totalorder %s1444_s20, 3  ;;  %s1446_s25 = smov [#allocation4]  }
   0x8   : > { %s1778_s22 = scalar_select %p1511_p1, 1, 0 }
   0x9   : > { %p1519_p4 = por %p1511_p1, %p76_p0  ;;  %p1523_p5 = pnand %p1016_p2, %p155_p3 }
   0xa   : > { %s167_s26 = sshll.u32 %s1446_s25, 4  ;;  %s30_s28 = sadd.s32 1, %s1440_s19  ;;  %s168_s26 = int_to_ptr.vmem [resolvable:$true] %s167_s26 }
   0xb   : > { %s1779_s23 = scalar_select %p1519_p4, 1, 0 }
   0xc   : > { %s1780_s24 = scalar_select %p1523_p5, 1, 0 }
   0xd   : > { %p1189_p6 = pneg %p1523_p5  ;;  %s1332_s5 = scalar_lea.hbm %s1771_s2, 1024 }
   0xe   : > { %p1333_p8 = scmp.ne.s32.totalorder %s1771_s2, %s1332_s5  ;;  %p1339_p12 = scmp.lt.u32.totalorder %s1332_s5, %s1771_s2 }
   0xf   : > { %p1531_p7 = pnand %p1189_p6, %p1511_p1 }
  0x11   : > { %p1334_p9 = pneg %p1531_p7 }
  0x13   : > { %p1335_p10 = pnand %p1334_p9, %p1333_p8 }
  0x15   : > { %p1336_p11 = pneg %p1335_p10 }
  0x17   : > { %p1341_p13 = pnand %p1339_p12, %p1336_p11 }
  0x19   : > { %1344 = shalt.err (!%p1341_p13)
}
  0x1a   : > { %s1345_s10 = scalar_lea.vmem %s168_s26, 1024  ;;  %p1353_p6 = scmp.lt.s32.totalorder %s168_s26, %s168_s26 }
  0x1b   : > { %p1346_p0 = scmp.ne.s32.totalorder %s168_s26, %s1345_s10  ;;  %p1354_p1 = scmp.lt.s32.totalorder %s1345_s10, %s1345_s10 }
  0x1d   : > { %p1348_p2 = pnand %p1346_p0, %p1334_p9  ;;  %p1355_p4 = por %p1354_p1, %p1353_p6 }
  0x1f   : > { %p1349_p3 = pneg %p1348_p2 }
  0x21   : > { %p1356_p5 = pnand %p1355_p4, %p1349_p3 }
  0x23   : > { %1359 = shalt.err (!%p1356_p5)
}
  0x24   : > { %s1447_s11 = smov 256   ;;  %s1448_s12 = smov 16  }
  0x25   : > { %1192 = dma.hbm_to_vmem [thread:$0]  (!%p1531_p7), %s1771_s2, 1024, %s168_s26, [#allocation5], %s1447_s11, %s1447_s11, %s1448_s12  }
  0x26   : > { %p32_p1 = scmp.ge.s32.totalorder %s30_s28, 2  ;;  %s63_s15 = sadd.s32 1, %s1432_s17 }
  0x27   : > { %p70_p4 = scmp.ne.s32.totalorder %s1432_s17, %s1428_s16  ;;  %p71_p5 = scmp.eq.s32.totalorder %s1444_s20, 0 }
  0x28   : > { %s1792_s28 = smov (%p32_p1, %s30_s28), 0  ;;  %p1198_p9 = scmp.lt.s32.totalorder %s1444_s20, 2 }
  0x29   : > { %p72_p8 = por %p71_p5, %p70_p4  ;;  %s60_s21 = ssub.s32 %s1440_s19, %s1792_s28 }
  0x2a   : > { %s190_s25 = sand.u32 1, %s1432_s17   ;;  %p61_p10 = scmp.eq.s32.totalorder %s60_s21, 0 }
  0x2b   : > { %s1180_s29 = smul.u32 68, %s190_s25  ;;  %p1562_p11 = pnand %p1198_p9, %p72_p8 }
  0x2c   : > { %s1567_s26 = scalar_select %p61_p10, %s1432_s17, %s63_s15  }
  0x2d   : > { %s1181_s27 = smul.u32 1088, %s1440_s19  ;;  %s194_s5 = scalar_lea.vmem [#allocation2], %s1180_s29 }
  0x2e   : > { %s201_s6 = sshll.u32 %s194_s5, 4  ;;  %s1577_s10 = scalar_lea.sflag [#allocation3], %s190_s25  ;;  %s1575_s6 = int_to_ptr.vmem [resolvable:$true] %s201_s6 }
  0x2f   : > { %s1573_s9 = scalar_lea.hbm %s1770_s1, %s1181_s27  ;;  %p1362_p12 = pneg %p1562_p11 }
  0x30   : > { %s1360_s11 = scalar_lea.hbm %s1573_s9, 1088  ;;  %s1365_s14 = scalar_lea.hbm %s1770_s1, 2176 }
  0x31   : > { %p1361_p7 = scmp.ne.s32.totalorder %s1573_s9, %s1360_s11  ;;  %p1366_p2 = scmp.lt.u32.totalorder %s1573_s9, %s1770_s1 }
  0x32   : > { %p1367_p3 = scmp.lt.u32.totalorder %s1365_s14, %s1360_s11  ;;  %p1369_p1 = scmp.lt.u32.totalorder %s1360_s11, %s1573_s9 }
  0x33   : > { %p1363_p13 = pnand %p1362_p12, %p1361_p7 }
  0x34   : > { %p1368_p6 = por %p1367_p3, %p1366_p2 }
  0x35   : > { %p1364_p0 = pneg %p1363_p13 }
  0x36   : > { %p1370_p4 = por %p1369_p1, %p1368_p6 }
  0x38   : > { %p1371_p5 = pnand %p1370_p4, %p1364_p0 }
  0x3a   : > { %1374 = shalt.err (!%p1371_p5)
}
  0x3b   : > { %s1375_s25 = scalar_lea.vmem %s1575_s6, 1088  ;;  %s1449_s29 = smov [#allocation2]  }
  0x3c   : > { %p1376_p8 = scmp.ne.s32.totalorder %s1575_s6, %s1375_s25  ;;  %s1380_s27 = sshll.u32 %s1449_s29, 4  ;;  %s1381_s27 = int_to_ptr.vmem [resolvable:$false] %s1380_s27 }
  0x3d   : > { %s1382_s5 = scalar_lea.vmem %s1381_s27, 2176  ;;  %p1383_p7 = scmp.lt.s32.totalorder %s1575_s6, %s1381_s27 }
  0x3e   : > { %p1378_p9 = pnand %p1376_p8, %p1362_p12  ;;  %p1384_p13 = scmp.lt.s32.totalorder %s1382_s5, %s1375_s25 }
  0x40   : > { %p1379_p10 = pneg %p1378_p9  ;;  %p1385_p2 = por %p1384_p13, %p1383_p7 }
  0x42   : > { %p1386_p3 = pnand %p1385_p2, %p1379_p10 }
  0x44   : > { %1389 = shalt.err (!%p1386_p3)
}
  0x45   : > { %s1450_s7 = smov 64   ;;  %s1451_s8 = smov 4  }
  0x46   : > { %1196 = dma.hbm_to_vmem [thread:$0]  (!%p1562_p11), %s1573_s9, 1088, %s1575_s6, %s1577_s10, %s1450_s7, %s1450_s7, %s1451_s8  }
  0x47   : > { %p1783_p12 = scmp.ne.s32.totalorder %s1780_s24, 0 }
  0x48   : > { %s215_s11 = sand.u32 (!%p1783_p12), 1, %s1428_s16   ;;  %p1784_p0 = scmp.ne.s32.totalorder (!%p1783_p12), %s1779_s23, 0 }
  0x49   : > { %213 = sbr.rel (%p1783_p12) target bundleno = 1169 (0x491), region = 36  ;;  %s216_s13 = scalar_lea.sflag (!%p1783_p12), [#allocation3], %s215_s11 }
  0x4a   : > { %s1182_s12 = smul.u32 (!%p1783_p12), 68, %s215_s11 }
  0x4c   : > { %s1608_s14 = scalar_lea.vmem (!%p1783_p12), [#allocation2], %s1182_s12 }
  0x50   : > { %1415 = dma.done.wait (%p1784_p0), %s216_s13, 1088  }
  0x51   : > { %1417 = vsyncadd (%p1784_p0), %s216_s13, 4294966208  ;;  %p1785_p6 = scmp.ne.s32.totalorder %s1778_s22, 0 }
  0x53   : > { %1419 = dma.done.wait (%p1785_p6), [#allocation5], 1024  }
  0x54   : > { %1421 = vsyncadd (%p1785_p6), [#allocation5], 4294966272  ;;  %p251_p11 = scmp.lt.s32.totalorder %s1436_s18, 1  ;;  %v1452_v0 = vmov 0   ;;  %v1453_v11 = vmov 0.0   ;;  %v843_v19 = vld [vmem:[%s1772_s3] sm:$0xff]  ;;  %v375_v23 = vlaneseq }
  0x55   : > { %1258 = vset.pattern.permute.xlu1 %v1452_v0  ;;  %1084 = vmatprep.subr.bf16.mxu0 %v1453_v11  ;;  %v844_v20 = vld [vmem:[%s1772_s3 + $0x8] sm:$0xff]  ;;  %v845_v21 = vld [vmem:[%s1772_s3 + $0x10] sm:$0xff]  ;;  %v846_v22 = vld [vmem:[%s1772_s3 + $0x18] sm:$0x3f]  ;;  %vm1454_vm0 = vmmov 0   ;;  %vm732_vm1 = vcmask 64512  }
  0x56   : > { %s1794_s18 = smov (!%p251_p11, %s1436_s18), 1  ;;  %1100 = vmatprep.mubr.msk.bf16.mxu0 %vm1454_vm0, %v1453_v11  ;;  %v376_v24 = vshrl.u32 %v375_v23, 7 }
  0x57   : > { %s253_s6 = scalar_lea.vmem %s1769_s0, %s1794_s18  ;;  %s1056_s27 = sshll.u32 %s1794_s18, 5 }
  0x58   : > { %v261_v1 = vld [vmem:[%s253_s6] sm:$0x1]  ;;  %v377_v25 = vsub.s32 0, %v376_v24  ;;  %s258_s8 = scalar_lea.vmem %s1773_s4, %s1056_s27 }
  0x59   : > { %262 = vxpose.xlu0.b32.start.end [1/1] (short) %v261_v1, 128 }
  0x5a   : > { %v1642_v26 = vrot.slane %v261_v1, %v377_v25 }
  0x82   : > { %1257 = vset.pattern.permute.xlu0 %v1452_v0 }
  0xd9   : > { %v278_v2 = vpop.trf.xlu0 }
  0xda   : > { %296 = vperm.xlu0 %1257, %v278_v2  }
  0xdd   : > { %v279_v3 = vpop.trf.xlu0 }
  0xde   : > { %301 = vperm.xlu1 %1258, %v279_v3  }
  0xe1   : > { %v280_v4 = vpop.trf.xlu0 }
  0xe2   : > { %306 = vperm.xlu1 %1258, %v280_v4  }
  0xe5   : > { %v281_v5 = vpop.trf.xlu0 }
  0xe6   : > { %311 = vperm.xlu1 %1258, %v281_v5  }
  0xe9   : > { %v282_v6 = vpop.trf.xlu0 }
  0xea   : > { %316 = vperm.xlu1 %1258, %v282_v6  }
  0xed   : > { %v283_v7 = vpop.trf.xlu0 }
  0xee   : > { %321 = vperm.xlu1 %1258, %v283_v7  }
  0xf1   : > { %v284_v8 = vpop.trf.xlu0 }
  0xf2   : > { %326 = vperm.xlu1 %1258, %v284_v8  }
  0xf5   : > { %v285_v9 = vpop.trf.xlu0 }
  0xf6   : > { %331 = vperm.xlu1 %1258, %v285_v9  }
  0xf9   : > { %v286_v10 = vpop.trf.xlu0 }
  0xfa   : > { %336 = vperm.xlu1 %1258, %v286_v10  }
  0xfd   : > { %v287_v12 = vpop.trf.xlu0 }
  0xfe   : > { %341 = vperm.xlu1 %1258, %v287_v12  }
 0x101   : > { %v288_v13 = vpop.trf.xlu0 }
 0x102   : > { %346 = vperm.xlu1 %1258, %v288_v13  }
 0x105   : > { %v289_v14 = vpop.trf.xlu0 }
 0x106   : > { %351 = vperm.xlu1 %1258, %v289_v14  }
 0x109   : > { %v290_v15 = vpop.trf.xlu0 }
 0x10a   : > { %356 = vperm.xlu1 %1258, %v290_v15  }
 0x10d   : > { %v291_v16 = vpop.trf.xlu0 }
 0x10e   : > { %361 = vperm.xlu1 %1258, %v291_v16  }
 0x111   : > { %v292_v17 = vpop.trf.xlu0 }
 0x112   : > { %366 = vperm.xlu1 %1258, %v292_v17  }
 0x115   : > { %v293_v18 = vpop.trf.xlu0 }
 0x116   : > { %371 = vperm.xlu1 %1258, %v293_v18  }
 0x11a   : > { %849 = vperm.xlu1 %1258, %v843_v19  }
 0x11e   : > { %854 = vperm.xlu1 %1258, %v844_v20  }
 0x122   : > { %859 = vperm.xlu1 %1258, %v845_v21  }
 0x126   : > { %864 = vperm.xlu1 %1258, %v846_v22  }
 0x159   : > { %v297_v27 = vpop.permute.xlu0 %296 }
 0x15a   : > { %v380_v28 = vmul.f32 %v1642_v26, %v297_v27 }
 0x15c   : > { %v1024_v29 = vmul.f32 -1.442695, %v380_v28 }
 0x15d   : > { %v302_v30 = vpop.permute.xlu1 %301 }
 0x15e   : > { %1268 = vpow2.f32 %v1024_v29  ;;  %v381_v31 = vmul.f32 %v1642_v26, %v302_v30 }
 0x160   : > { %v1025_v32 = vmul.f32 -1.442695, %v381_v31 }
 0x161   : > { %v307_v33 = vpop.permute.xlu1 %306 }
 0x162   : > { %1270 = vpow2.f32 %v1025_v32  ;;  %v382_v34 = vmul.f32 %v1642_v26, %v307_v33 }
 0x164   : > { %v1026_v35 = vmul.f32 -1.442695, %v382_v34 }
 0x165   : > { %v312_v36 = vpop.permute.xlu1 %311 }
 0x166   : > { %1272 = vpow2.f32 %v1026_v35  ;;  %v383_v37 = vmul.f32 %v1642_v26, %v312_v36 }
 0x168   : > { %v1269_v38 = vpop.eup %1268  ;;  %v1027_v39 = vmul.f32 -1.442695, %v383_v37 }
 0x169   : > { %v444_v40 = vadd.f32 1.0, %v1269_v38  ;;  %v317_v41 = vpop.permute.xlu1 %316 }
 0x16a   : > { %1274 = vpow2.f32 %v1027_v39  ;;  %v384_v42 = vmul.f32 %v1642_v26, %v317_v41 }
 0x16b   : > { %1276 = vrcp.f32 %v444_v40 }
 0x16c   : > { %v1271_v43 = vpop.eup %1270  ;;  %v1028_v44 = vmul.f32 -1.442695, %v384_v42 }
 0x16d   : > { %v445_v45 = vadd.f32 1.0, %v1271_v43  ;;  %v322_v46 = vpop.permute.xlu1 %321 }
 0x16e   : > { %1278 = vpow2.f32 %v1028_v44  ;;  %v385_v47 = vmul.f32 %v1642_v26, %v322_v46 }
 0x16f   : > { %1280 = vrcp.f32 %v445_v45 }
 0x170   : > { %v1273_v48 = vpop.eup %1272  ;;  %v1029_v49 = vmul.f32 -1.442695, %v385_v47 }
 0x171   : > { %v446_v50 = vadd.f32 1.0, %v1273_v48  ;;  %v327_v51 = vpop.permute.xlu1 %326 }
 0x172   : > { %1282 = vpow2.f32 %v1029_v49  ;;  %v386_v52 = vmul.f32 %v1642_v26, %v327_v51 }
 0x173   : > { %1284 = vrcp.f32 %v446_v50 }
 0x174   : > { %v1275_v53 = vpop.eup %1274  ;;  %v1030_v54 = vmul.f32 -1.442695, %v386_v52 }
 0x175   : > { %v447_v55 = vadd.f32 1.0, %v1275_v53  ;;  %v332_v56 = vpop.permute.xlu1 %331  ;;  %v1277_v58 = vpop.eup %1276 }
 0x176   : > { %1286 = vpow2.f32 %v1030_v54  ;;  %v387_v57 = vmul.f32 %v1642_v26, %v332_v56 }
 0x177   : > { %1288 = vrcp.f32 %v447_v55 }
 0x178   : > { %v1279_v59 = vpop.eup %1278  ;;  %v1031_v60 = vmul.f32 -1.442695, %v387_v57 }
 0x179   : > { %v1281_v61 = vpop.eup %1280  ;;  %v448_v62 = vadd.f32 1.0, %v1279_v59  ;;  %v337_v63 = vpop.permute.xlu1 %336 }
 0x17a   : > { %1290 = vpow2.f32 %v1031_v60  ;;  %v388_v0 = vmul.f32 %v1642_v26, %v337_v63  ;;  %v1653_v1 = vpack.c.bf16 %v1281_v61, %v1277_v58 }
 0x17b   : > { %1292 = vrcp.f32 %v448_v62 }
 0x17c   : > { %v1283_v2 = vpop.eup %1282  ;;  %v1032_v3 = vmul.f32 -1.442695, %v388_v0  ;;  %1085 = vmatpush3.bf16.xpose.msra.mxu0 %v1653_v1 }
 0x17d   : > { %v449_v4 = vadd.f32 1.0, %v1283_v2  ;;  %v342_v5 = vpop.permute.xlu1 %341  ;;  %1086 = vmatprep.subr.bf16.mxu0 %v1453_v11  ;;  %v1285_v7 = vpop.eup %1284 }
 0x17e   : > { %1294 = vpow2.f32 %v1032_v3  ;;  %v389_v6 = vmul.f32 %v1642_v26, %v342_v5 }
 0x17f   : > { %1296 = vrcp.f32 %v449_v4 }
 0x180   : > { %v1287_v8 = vpop.eup %1286  ;;  %v1033_v9 = vmul.f32 -1.442695, %v389_v6  ;;  %v1259_v6 = vld [vmem:[%s1608_s14] sm:$0xff]  }
 0x181   : > { %v1289_v10 = vpop.eup %1288  ;;  %v450_v12 = vadd.f32 1.0, %v1287_v8  ;;  %v347_v13 = vpop.permute.xlu1 %346  ;;  %v1261_v8 = vld [vmem:[%s1608_s14 + $0x10] sm:$0xff]  }
 0x182   : > { %1298 = vpow2.f32 %v1033_v9  ;;  %v390_v14 = vmul.f32 %v1642_v26, %v347_v13  ;;  %v1659_v15 = vpack.c.bf16 %v1289_v10, %v1285_v7  ;;  %v1260_v7 = vld [vmem:[%s1608_s14 + $0x8] sm:$0xff]   ;;  %v1262_v9 = vld [vmem:[%s1608_s14 + $0x18] sm:$0xff]   ;;  %v1263_v10 = vld [vmem:[%s1608_s14 + $0x20] sm:$0xff]  }
 0x183   : > { %1300 = vrcp.f32 %v450_v12  ;;  %v1264_v12 = vld [vmem:[%s1608_s14 + $0x28] sm:$0xff]   ;;  %v1265_v13 = vld [vmem:[%s1608_s14 + $0x30] sm:$0xff]  }
 0x184   : > { %v1291_v16 = vpop.eup %1290  ;;  %v1034_v17 = vmul.f32 -1.442695, %v390_v14  ;;  %1087 = vmatpush3.bf16.xpose.msra.mxu0 %v1659_v15  ;;  %v1266_v14 = vld [vmem:[%s1608_s14 + $0x38] sm:$0xff]  }
 0x185   : > { %v451_v18 = vadd.f32 1.0, %v1291_v16  ;;  %v352_v19 = vpop.permute.xlu1 %351  ;;  %1088 = vmatprep.subr.bf16.mxu0 %v1453_v11  ;;  %v1293_v21 = vpop.eup %1292  ;;  %v1267_v16 = vld [vmem:[%s1608_s14 + $0x40] ss:$0 sps:$4 sm:$0xff]  }
 0x186   : > { %1302 = vpow2.f32 %v1034_v17  ;;  %v391_v20 = vmul.f32 %v1642_v26, %v352_v19  ;;  %v1455_v17 = vmov 0.0|0.0  }
 0x187   : > { %1304 = vrcp.f32 %v451_v18  ;;  %1156 = vmatprep.subr.bf16.mxu1 %v1455_v17  ;;  %v725_v18 = vld [vmem:[#allocation4 + $0x8] sm:$0xff] }
 0x188   : > { %v1295_v22 = vpop.eup %1294  ;;  %v1035_v24 = vmul.f32 -1.442695, %v391_v20  ;;  %1049 = vmatprep.mubr.msk.f32.mxu1 %vm732_vm1, %v725_v18 }
 0x189   : > { %v1297_v25 = vpop.eup %1296  ;;  %v452_v27 = vadd.f32 1.0, %v1295_v22  ;;  %v357_v28 = vpop.permute.xlu1 %356 }
 0x18a   : > { %1306 = vpow2.f32 %v1035_v24  ;;  %v392_v29 = vmul.f32 %v1642_v26, %v357_v28  ;;  %v1665_v30 = vpack.c.bf16 %v1297_v25, %v1293_v21 }
 0x18b   : > { %1308 = vrcp.f32 %v452_v27 }
 0x18c   : > { %v1299_v31 = vpop.eup %1298  ;;  %v1036_v32 = vmul.f32 -1.442695, %v392_v29  ;;  %1089 = vmatpush3.bf16.xpose.msra.mxu0 %v1665_v30 }
 0x18d   : > { %v453_v33 = vadd.f32 1.0, %v1299_v31  ;;  %v362_v34 = vpop.permute.xlu1 %361  ;;  %1090 = vmatprep.subr.bf16.mxu0 %v1453_v11  ;;  %v1301_v36 = vpop.eup %1300 }
 0x18e   : > { %1310 = vpow2.f32 %v1036_v32  ;;  %v393_v35 = vmul.f32 %v1642_v26, %v362_v34 }
 0x18f   : > { %1312 = vrcp.f32 %v453_v33 }
 0x190   : > { %v1303_v37 = vpop.eup %1302  ;;  %v1037_v38 = vmul.f32 -1.442695, %v393_v35 }
 0x191   : > { %v1305_v39 = vpop.eup %1304  ;;  %v454_v40 = vadd.f32 1.0, %v1303_v37  ;;  %v367_v41 = vpop.permute.xlu1 %366 }
 0x192   : > { %1314 = vpow2.f32 %v1037_v38  ;;  %v394_v42 = vmul.f32 %v1642_v26, %v367_v41  ;;  %v1671_v43 = vpack.c.bf16 %v1305_v39, %v1301_v36 }
 0x193   : > { %1316 = vrcp.f32 %v454_v40 }
 0x194   : > { %v1307_v44 = vpop.eup %1306  ;;  %v1038_v45 = vmul.f32 -1.442695, %v394_v42  ;;  %1091 = vmatpush3.bf16.xpose.msra.mxu0 %v1671_v43 }
 0x195   : > { %v455_v46 = vadd.f32 1.0, %v1307_v44  ;;  %v372_v47 = vpop.permute.xlu1 %371  ;;  %1092 = vmatprep.subr.bf16.mxu0 %v1453_v11  ;;  %v1309_v49 = vpop.eup %1308 }
 0x196   : > { %1318 = vpow2.f32 %v1038_v45  ;;  %v395_v48 = vmul.f32 %v1642_v26, %v372_v47 }
 0x197   : > { %1320 = vrcp.f32 %v455_v46 }
 0x198   : > { %v1311_v50 = vpop.eup %1310  ;;  %v1039_v51 = vmul.f32 -1.442695, %v395_v48 }
 0x199   : > { %v1313_v52 = vpop.eup %1312  ;;  %v456_v53 = vadd.f32 1.0, %v1311_v50 }
 0x19a   : > { %1322 = vpow2.f32 %v1039_v51  ;;  %v1676_v54 = vpack.c.bf16 %v1313_v52, %v1309_v49 }
 0x19b   : > { %1324 = vrcp.f32 %v456_v53 }
 0x19c   : > { %v1315_v55 = vpop.eup %1314  ;;  %1093 = vmatpush3.bf16.xpose.msra.mxu0 %v1676_v54 }
 0x19d   : > { %v457_v56 = vadd.f32 1.0, %v1315_v55  ;;  %1094 = vmatprep.subr.bf16.mxu0 %v1453_v11  ;;  %v1317_v57 = vpop.eup %1316 }
 0x19f   : > { %1326 = vrcp.f32 %v457_v56 }
 0x1a0   : > { %v1319_v58 = vpop.eup %1318 }
 0x1a1   : > { %v1321_v26 = vpop.eup %1320  ;;  %v458_v59 = vadd.f32 1.0, %v1319_v58 }
 0x1a2   : > { %v1680_v60 = vpack.c.bf16 %v1321_v26, %v1317_v57 }
 0x1a3   : > { %1328 = vrcp.f32 %v458_v59 }
 0x1a4   : > { %v1323_v61 = vpop.eup %1322  ;;  %1095 = vmatpush3.bf16.xpose.msra.mxu0 %v1680_v60 }
 0x1a5   : > { %v459_v62 = vadd.f32 1.0, %v1323_v61  ;;  %1096 = vmatprep.subr.bf16.mxu0 %v1453_v11  ;;  %v1325_v63 = vpop.eup %1324 }
 0x1a7   : > { %1330 = vrcp.f32 %v459_v62 }
 0x1a9   : > { %v1327_v0 = vpop.eup %1326 }
 0x1aa   : > { %v1684_v2 = vpack.c.bf16 %v1327_v0, %v1325_v63 }
 0x1ac   : > { %1097 = vmatpush3.bf16.xpose.msra.mxu0 %v1684_v2 }
 0x1ad   : > { %1098 = vmatprep.subr.bf16.mxu0 %v1453_v11  ;;  %v1329_v3 = vpop.eup %1328 }
 0x1b1   : > { %v1331_v4 = vpop.eup %1330 }
 0x1b2   : > { %v1688_v5 = vpack.c.bf16 %v1331_v4, %v1329_v3 }
 0x1b4   : > { %1099 = vmatpush3.bf16.xpose.msra.mxu0 %v1688_v5 }
 0x1bb   : > { %1101 = vmatmul.mubr.bf16.vlgmr.msra.gmra.mrb[0].mxu0 %v1259_v6 }
 0x1bc   : > { %1104 = vmatprep.mubr.msk.bf16.mxu0 %vm1454_vm0, %v1453_v11 }
 0x1c3   : > { %1105 = vmatmul.mubr.bf16.gmra.mrb[4].mxu0 %v1260_v7 }
 0x1c4   : > { %1108 = vmatprep.mubr.msk.bf16.mxu0 %vm1454_vm0, %v1453_v11 }
 0x1cb   : > { %1109 = vmatmul.mubr.bf16.gmra.mrb[8].mxu0 %v1261_v8 }
 0x1cc   : > { %1112 = vmatprep.mubr.msk.bf16.mxu0 %vm1454_vm0, %v1453_v11 }
 0x1d3   : > { %1113 = vmatmul.mubr.bf16.gmra.mrb[12].mxu0 %v1262_v9 }
 0x1d4   : > { %1116 = vmatprep.mubr.msk.bf16.mxu0 %vm1454_vm0, %v1453_v11 }
 0x1db   : > { %1117 = vmatmul.mubr.bf16.gmra.mrb[16].mxu0 %v1263_v10 }
 0x1dc   : > { %1120 = vmatprep.mubr.msk.bf16.mxu0 %vm1454_vm0, %v1453_v11 }
 0x1e3   : > { %1121 = vmatmul.mubr.bf16.gmra.mrb[20].mxu0 %v1264_v12 }
 0x1e4   : > { %1124 = vmatprep.mubr.msk.bf16.mxu0 %vm1454_vm0, %v1453_v11 }
 0x1eb   : > { %1125 = vmatmul.mubr.bf16.gmra.mrb[24].mxu0 %v1265_v13 }
 0x1ec   : > { %1128 = vmatprep.mubr.msk.bf16.mxu0 %vm1454_vm0, %v1453_v11 }
 0x1f3   : > { %1129 = vmatmul.mubr.bf16.gmra.mrb[28].mxu0 %v1266_v14 }
 0x1f4   : > { %1132 = vmatprep.mubr.msk.bf16.mxu0 %vm1454_vm0, %v1453_v11 }
 0x1fb   : > { %1133 = vmatmul.mubr.bf16.gmra.mrb[32].mxu0 %v1267_v16 }
 0x28e   : > { %v603_v19 = vpop.f32.mrb[0].mxu0 }
 0x28f   : > { %v690_v20 = vmul.f32 0.01, %v603_v19  ;;  %v1102_v21 = vpop.f32.mrb[1].mxu0  ;;  %vm673_vm2 = vcmp.gt.f32.partialorder %v603_v19, 0.0 }
 0x290   : > { %v606_v22 = vpop.f32.mrb[2].mxu0 }
 0x291   : > { %vm674_vm3 = vcmp.gt.f32.partialorder %v606_v22, 0.0  ;;  %v691_v24 = vmul.f32 0.01, %v606_v22  ;;  %v1103_v25 = vpop.f32.mrb[3].mxu0  ;;  %v707_v27 = vsel %vm673_vm2, %v603_v19, %v690_v20 }
 0x293   : > { %v708_v28 = vsel %vm674_vm3, %v606_v22, %v691_v24 }
 0x294   : > { %v1157_v29 = vpack.c.bf16 %v708_v28, %v707_v27 }
 0x296   : > { %v611_v31 = vpop.f32.mrb[4].mxu0  ;;  %1158 = vmatpush1.bf16.msra.mxu1 %v1157_v29 }
 0x297   : > { %v692_v32 = vmul.f32 0.01, %v611_v31  ;;  %v1106_v33 = vpop.f32.mrb[5].mxu0  ;;  %1159 = vmatprep.subr.bf16.mxu1 %v1455_v17  ;;  %vm675_vm4 = vcmp.gt.f32.partialorder %v611_v31, 0.0 }
 0x298   : > { %v614_v34 = vpop.f32.mrb[6].mxu0 }
 0x299   : > { %vm676_vm5 = vcmp.gt.f32.partialorder %v614_v34, 0.0  ;;  %v693_v35 = vmul.f32 0.01, %v614_v34  ;;  %v1107_v36 = vpop.f32.mrb[7].mxu0  ;;  %v709_v37 = vsel %vm675_vm4, %v611_v31, %v692_v32 }
 0x29b   : > { %v710_v38 = vsel %vm676_vm5, %v614_v34, %v693_v35 }
 0x29c   : > { %v1160_v39 = vpack.c.bf16 %v710_v38, %v709_v37 }
 0x29e   : > { %v619_v40 = vpop.f32.mrb[8].mxu0  ;;  %1161 = vmatpush1.bf16.msra.mxu1 %v1160_v39 }
 0x29f   : > { %v694_v41 = vmul.f32 0.01, %v619_v40  ;;  %v1110_v42 = vpop.f32.mrb[9].mxu0  ;;  %1162 = vmatprep.subr.bf16.mxu1 %v1455_v17  ;;  %vm677_vm6 = vcmp.gt.f32.partialorder %v619_v40, 0.0 }
 0x2a0   : > { %v622_v44 = vpop.f32.mrb[10].mxu0 }
 0x2a1   : > { %vm678_vm7 = vcmp.gt.f32.partialorder %v622_v44, 0.0  ;;  %v695_v45 = vmul.f32 0.01, %v622_v44  ;;  %v1111_v46 = vpop.f32.mrb[11].mxu0  ;;  %v711_v47 = vsel %vm677_vm6, %v619_v40, %v694_v41 }
 0x2a2   : > { %v724_v46 = vld [vmem:[#allocation4] sm:$0xff] }
 0x2a3   : > { %v712_v48 = vsel %vm678_vm7, %v622_v44, %v695_v45 }
 0x2a4   : > { %v1163_v49 = vpack.c.bf16 %v712_v48, %v711_v47 }
 0x2a6   : > { %v627_v50 = vpop.f32.mrb[12].mxu0  ;;  %1164 = vmatpush1.bf16.msra.mxu1 %v1163_v49  ;;  %v726_v49 = vld [vmem:[#allocation4 + $0x10] sm:$0xff] }
 0x2a7   : > { %v696_v51 = vmul.f32 0.01, %v627_v50  ;;  %v1114_v52 = vpop.f32.mrb[13].mxu0  ;;  %1165 = vmatprep.subr.bf16.mxu1 %v1455_v17  ;;  %vm679_vm8 = vcmp.gt.f32.partialorder %v627_v50, 0.0 }
 0x2a8   : > { %v630_v53 = vpop.f32.mrb[14].mxu0  ;;  %v731_v52 = vld [vmem:[#allocation4 + $0x38] sm:$0x3f] }
 0x2a9   : > { %vm680_vm9 = vcmp.gt.f32.partialorder %v630_v53, 0.0  ;;  %v697_v55 = vmul.f32 0.01, %v630_v53  ;;  %v1115_v56 = vpop.f32.mrb[15].mxu0  ;;  %v713_v57 = vsel %vm679_vm8, %v627_v50, %v696_v51  ;;  %v729_v50 = vld [vmem:[#allocation4 + $0x28] sm:$0xff]  ;;  %v728_v51 = vld [vmem:[#allocation4 + $0x20] sm:$0xff] }
 0x2ab   : > { %v714_v58 = vsel %vm680_vm9, %v630_v53, %v697_v55 }
 0x2ac   : > { %v1166_v26 = vpack.c.bf16 %v714_v58, %v713_v57 }
 0x2ae   : > { %v635_v59 = vpop.f32.mrb[16].mxu0  ;;  %1167 = vmatpush1.bf16.msra.mxu1 %v1166_v26 }
 0x2af   : > { %v698_v61 = vmul.f32 0.01, %v635_v59  ;;  %v1118_v62 = vpop.f32.mrb[17].mxu0  ;;  %1168 = vmatprep.subr.bf16.mxu1 %v1455_v17  ;;  %vm681_vm10 = vcmp.gt.f32.partialorder %v635_v59, 0.0 }
 0x2b0   : > { %v638_v63 = vpop.f32.mrb[18].mxu0 }
 0x2b1   : > { %vm682_vm11 = vcmp.gt.f32.partialorder %v638_v63, 0.0  ;;  %v699_v0 = vmul.f32 0.01, %v638_v63  ;;  %v1119_v3 = vpop.f32.mrb[19].mxu0  ;;  %v715_v4 = vsel %vm681_vm10, %v635_v59, %v698_v61 }
 0x2b3   : > { %v716_v6 = vsel %vm682_vm11, %v638_v63, %v699_v0 }
 0x2b4   : > { %v1169_v7 = vpack.c.bf16 %v716_v6, %v715_v4 }
 0x2b6   : > { %v643_v8 = vpop.f32.mrb[20].mxu0  ;;  %1170 = vmatpush1.bf16.msra.mxu1 %v1169_v7 }
 0x2b7   : > { %v700_v9 = vmul.f32 0.01, %v643_v8  ;;  %v1122_v10 = vpop.f32.mrb[21].mxu0  ;;  %1171 = vmatprep.subr.bf16.mxu1 %v1455_v17  ;;  %vm683_vm12 = vcmp.gt.f32.partialorder %v643_v8, 0.0 }
 0x2b8   : > { %v646_v12 = vpop.f32.mrb[22].mxu0 }
 0x2b9   : > { %vm684_vm13 = vcmp.gt.f32.partialorder %v646_v12, 0.0  ;;  %v701_v13 = vmul.f32 0.01, %v646_v12  ;;  %v1123_v14 = vpop.f32.mrb[23].mxu0  ;;  %v717_v16 = vsel %vm683_vm12, %v643_v8, %v700_v9 }
 0x2bb   : > { %v718_v18 = vsel %vm684_vm13, %v646_v12, %v701_v13 }
 0x2bc   : > { %v1172_v19 = vpack.c.bf16 %v718_v18, %v717_v16 }
 0x2be   : > { %v651_v20 = vpop.f32.mrb[24].mxu0  ;;  %1173 = vmatpush1.bf16.msra.mxu1 %v1172_v19 }
 0x2bf   : > { %v702_v21 = vmul.f32 0.01, %v651_v20  ;;  %v1126_v22 = vpop.f32.mrb[25].mxu0  ;;  %1174 = vmatprep.subr.bf16.mxu1 %v1455_v17  ;;  %vm685_vm14 = vcmp.gt.f32.partialorder %v651_v20, 0.0 }
 0x2c0   : > { %v654_v24 = vpop.f32.mrb[26].mxu0 }
 0x2c1   : > { %vm686_vm15 = vcmp.gt.f32.partialorder %v654_v24, 0.0  ;;  %v703_v25 = vmul.f32 0.01, %v654_v24  ;;  %v1127_v27 = vpop.f32.mrb[27].mxu0  ;;  %v719_v28 = vsel %vm685_vm14, %v651_v20, %v702_v21 }
 0x2c3   : > { %v720_v29 = vsel %vm686_vm15, %v654_v24, %v703_v25 }
 0x2c4   : > { %v1175_v31 = vpack.c.bf16 %v720_v29, %v719_v28 }
 0x2c6   : > { %v659_v32 = vpop.f32.mrb[28].mxu0  ;;  %1176 = vmatpush1.bf16.msra.mxu1 %v1175_v31 }
 0x2c7   : > { %v704_v33 = vmul.f32 0.01, %v659_v32  ;;  %v1130_v34 = vpop.f32.mrb[29].mxu0  ;;  %1177 = vmatprep.subr.bf16.mxu1 %v1455_v17  ;;  %vm687_vm0 = vcmp.gt.f32.partialorder %v659_v32, 0.0  ;;  %v727_v17 = vld [vmem:[#allocation4 + $0x18] sm:$0xff] }
 0x2c8   : > { %v662_v35 = vpop.f32.mrb[30].mxu0 }
 0x2c9   : > { %vm688_vm2 = vcmp.gt.f32.partialorder %v662_v35, 0.0  ;;  %v705_v36 = vmul.f32 0.01, %v662_v35  ;;  %v1131_v37 = vpop.f32.mrb[31].mxu0  ;;  %v721_v38 = vsel %vm687_vm0, %v659_v32, %v704_v33 }
 0x2cb   : > { %v722_v39 = vsel %vm688_vm2, %v662_v35, %v705_v36 }
 0x2cc   : > { %v1178_v40 = vpack.c.bf16 %v722_v39, %v721_v38 }
 0x2ce   : > { %v667_v41 = vpop.f32.mrb[32].mxu0  ;;  %1179 = vmatpush1.bf16.msra.mxu1 %v1178_v40 }
 0x2cf   : > { %vm689_vm3 = vcmp.gt.f32.partialorder %v667_v41, 0.0  ;;  %v706_v42 = vmul.f32 0.01, %v667_v41  ;;  %v1134_v44 = vpop.f32.mrb[33].mxu0  ;;  %777 = vmatprep.subr.mxu1 %v1453_v11 }
 0x2d0   : > { %v670_v45 = vpop.f32.mrb[34].mxu0 }
 0x2d1   : > { %v1135_v47 = vpop.f32.mrb[35].mxu0  ;;  %v723_v48 = vsel %vm689_vm3, %v667_v41, %v706_v42 }
 0x2d2   : > { %778 = vmatpush1.msra.mxu1 %v723_v48 }
 0x2d3   : > { %810 = vmatmul.mubr.f32.vlgmr.msra.gmra.mrb[0].mxu1 %v724_v46  ;;  %1136 = vmatprep.subr.bf16.mxu1 %v1653_v1 }
 0x2d4   : > { %1137 = vmatpush3.bf16.msra.mxu1 %v1653_v1  ;;  %1050 = vmatprep.mubr.msk.f32.mxu1 %vm732_vm1, %v727_v17  ;;  %v730_v1 = vld [vmem:[#allocation4 + $0x30] sm:$0x3f] }
 0x2d5   : > { %1138 = vmatprep.subr.bf16.mxu1 %v1659_v15 }
 0x2d7   : > { %815 = vmatmul.mubr.f32.gmra.mrb[2].mxu1 %v726_v49 }
 0x2d8   : > { %1139 = vmatpush3.bf16.msra.mxu1 %v1659_v15  ;;  %1051 = vmatprep.mubr.msk.f32.mxu1 %vm732_vm1, %v729_v50  ;;  %v831_v15 = vand.u32 127, %v375_v23  ;;  %v850_v23 = vpop.permute.xlu1 %849 }
 0x2d9   : > { %1140 = vmatprep.subr.bf16.mxu1 %v1665_v30 }
 0x2db   : > { %820 = vmatmul.mubr.f32.gmra.mrb[4].mxu1 %v728_v51 }
 0x2dc   : > { %1141 = vmatpush3.bf16.msra.mxu1 %v1665_v30  ;;  %1052 = vmatprep.mubr.msk.f32.mxu1 %vm732_vm1, %v731_v52  ;;  %vm834_vm1 = vcmp.lt.s32.totalorder %v831_v15, 8  ;;  %v855_v63 = vpop.permute.xlu1 %854 }
 0x2dd   : > { %1142 = vmatprep.subr.bf16.mxu1 %v1671_v43  ;;  %v1053_v53 = vsel %vm834_vm1, 1.0, %v1453_v11 }
 0x2df   : > { %825 = vmatmul.mubr.f32.gmra.mrb[6].mxu1 %v730_v1 }
 0x2e0   : > { %1143 = vmatpush3.bf16.msra.mxu1 %v1671_v43  ;;  %v860_v0 = vpop.permute.xlu1 %859 }
 0x2e1   : > { %1144 = vmatprep.subr.bf16.mxu1 %v1676_v54 }
 0x2e4   : > { %1145 = vmatpush3.bf16.msra.mxu1 %v1676_v54  ;;  %v865_v6 = vpop.permute.xlu1 %864 }
 0x2e5   : > { %1146 = vmatprep.subr.bf16.mxu1 %v1680_v60 }
 0x2e8   : > { %1147 = vmatpush3.bf16.msra.mxu1 %v1680_v60 }
 0x2e9   : > { %1148 = vmatprep.subr.bf16.mxu1 %v1684_v2 }
 0x2ec   : > { %1149 = vmatpush3.bf16.msra.mxu1 %v1684_v2 }
 0x2ed   : > { %1150 = vmatprep.subr.bf16.mxu1 %v1688_v5 }
 0x2f0   : > { %1151 = vmatpush3.bf16.msra.mxu1 %v1688_v5 }
 0x3a6   : > { %v811_v30 = vpop.f32.mrb[0].mxu1 }
 0x3a7   : > { %v813_v43 = vpop.f32.mrb[1].mxu1  ;;  %v837_v55 = vmul.f32 %v1053_v53, %v811_v30 }
 0x3aa   : > { %v816_v54 = vpop.f32.mrb[2].mxu1 }
 0x3ab   : > { %v838_v56 = vmul.f32 %v1053_v53, %v816_v54  ;;  %v818_v60 = vpop.f32.mrb[3].mxu1 }
 0x3ad   : > { %v841_v57 = vpack.c.bf16 %v838_v56, %v837_v55 }
 0x3ae   : > { %v821_v58 = vpop.f32.mrb[4].mxu1 }
 0x3af   : > { %v823_v26 = vpop.f32.mrb[5].mxu1  ;;  %1152 = vmatprep.mubr.bf16.mxu1 %v841_v57  ;;  %v839_v59 = vmul.f32 %v1053_v53, %v821_v58 }
 0x3b2   : > { %v826_v2 = vpop.f32.mrb[6].mxu1 }
 0x3b3   : > { %v840_v61 = vmul.f32 %v1053_v53, %v826_v2  ;;  %v828_v5 = vpop.f32.mrb[7].mxu1 }
 0x3b5   : > { %v842_v62 = vpack.c.bf16 %v840_v61, %v839_v59 }
 0x3b7   : > { %1153 = vmatmul.mubr.bf16.vlgmr.msra.gmra.mrb[8].mxu1 %v842_v62 }
 0x48a   : > { %v1154_v11 = vpop.f32.mrb[8].mxu1 }
 0x48b   : > { %v910_v3 = vadd.f32 %v1154_v11, %v860_v0  ;;  %v901_v4 = vpop.f32.mrb[9].mxu1 }
 0x48c   : > { %v902_v7 = vadd.f32 %v901_v4, %v850_v23  ;;  %v1155_v8 = vpop.f32.mrb[10].mxu1 }
 0x48d   : > { %918 = vst [vmem:[%s258_s8 + $0x10] sm:$0xff] %v910_v3  ;;  %v913_v9 = vadd.f32 %v1155_v8, %v865_v6  ;;  %v904_v10 = vpop.f32.mrb[11].mxu1 }
 0x48e   : > { %916 = vst [vmem:[%s258_s8] sm:$0xff] %v902_v7  ;;  %v905_v12 = vadd.f32 %v904_v10, %v855_v63 }
 0x48f   : > { %919 = vst [vmem:[%s258_s8 + $0x18] sm:$0x3f] %v913_v9 }
 0x490   : > { %917 = vst [vmem:[%s258_s8 + $0x8] sm:$0xff] %v905_v12 }
 0x491 PF: > { %s18_s20 = sadd.s32 1, %s1444_s20   ;;  %s1786_s15 = smov %s1428_s16 }
 0x492   : > { %p15_p1 = scmp.ge.s32.totalorder %s18_s20, 4   ;;  %s1787_s16 = smov %s1432_s17 }
 0x493   : > { %s1788_s17 = smov %s1567_s26  ;;  %s1789_s18 = smov %s1440_s19 }
 0x494   : > { %s1790_s19 = smov %s1792_s28  ;;  %17 = sbr.rel (!%p15_p1) target bundleno = 5 (0x5), region = 83 }
 0x49b   :  { %941 = vsyncpa [#allocation3], 1 }
 0x49c   :  { %943 = vsyncpa [#allocation3 + $0x1], 1 }
 0x49d   :  { %944 = vsyncpa [#allocation5], 1 }

</bundles_post_ra>
